<compile_context>
chip_gen: v5e
topology: v5e:2x2
jax: 0.10.0
libtpu: 0.0.40
codegen_flags: <defaults>
</compile_context>

<pallas_src>
import functools
import math

import jax
import jax.numpy as jnp
from jax import lax
from jax.experimental import pallas as pl
from jax.experimental.pallas import tpu as pltpu

LN_EPS = 1e-5


def _round_up(x: int, m: int) -> int:
    return ((x + m - 1) // m) * m


def _vmem_budget_and_limit():
    """(tile budget, vmem_limit_bytes) per TPU generation."""
    cap = None
    try:
        cap = getattr(pltpu.get_tpu_info(), "vmem_capacity_bytes", None)
    except Exception:
        cap = None
    if cap is None:
        # Unknown generation: conservative values that are safe on v7x.
        return 24 * 1024 * 1024, 32 * 1024 * 1024
    if cap >= 100 * 1024 * 1024:
        # v5e / v6e: 128 MiB physical VMEM — use it.
        return 64 * 1024 * 1024, 80 * 1024 * 1024
    # v7x: 64 MiB physical VMEM per TensorCore.
    return 28 * 1024 * 1024, 44 * 1024 * 1024


def _ln_relu_epilogue(y, gamma_row, beta_row, inv_h, pad_cols):
    """Two-pass LayerNorm + affine + ReLU on an f32 (TM, H_pad) tile.

    Padded hidden columns of `y` are exactly zero (weight / bias are
    zero-padded), so the row sum over H_pad equals the true sum (mean exact),
    and each padded column contributes mean^2 to sum((y - mean)^2), which is
    subtracted exactly below.
    """
    mean = jnp.sum(y, axis=-1, keepdims=True) * inv_h
    c = y - mean
    s2 = jnp.sum(c * c, axis=-1, keepdims=True)
    if pad_cols:
        s2 = s2 - float(pad_cols) * (mean * mean)
    var = jnp.maximum(s2 * inv_h, 0.0)
    y_norm = c * lax.rsqrt(var + LN_EPS)
    # ReLU; Dropout == identity at inference.
    return jnp.maximum(y_norm * gamma_row + beta_row, 0.0)


def _resident_kernel(x_ref, w_ref, p_ref, o_ref, *, inv_h, pad_cols, mm_dtype):
    """Fast path: full weight resident in VMEM, single dot + epilogue per tile."""
    x = x_ref[...]
    w = w_ref[...]
    if mm_dtype is not None:
        x = x.astype(mm_dtype)
        w = w.astype(mm_dtype)
    p = p_ref[...]                      # (3, H_pad) f32: bias / gamma / beta
    y = jnp.dot(x, w, preferred_element_type=jnp.float32) + p[0:1, :]
    out = _ln_relu_epilogue(y, p[1:2, :], p[2:3, :], inv_h, pad_cols)
    o_ref[...] = out.astype(o_ref.dtype)


def _kgrid_kernel(x_ref, w_ref, p_ref, o_ref, acc_ref, *, inv_h, pad_cols, mm_dtype):
    """Fallback: K grid axis with an f32 VMEM accumulator."""
    k = pl.program_id(1)
    x = x_ref[...]
    w = w_ref[...]
    if mm_dtype is not None:
        x = x.astype(mm_dtype)
        w = w.astype(mm_dtype)
    part = jnp.dot(x, w, preferred_element_type=jnp.float32)

    @pl.when(k == 0)
    def _():                            # overwrite: saves a zero-init store+load
        acc_ref[...] = part

    @pl.when(k > 0)
    def _():
        acc_ref[...] += part

    @pl.when(k == pl.num_programs(1) - 1)
    def _():
        p = p_ref[...]
        y = acc_ref[...] + p[0:1, :]
        out = _ln_relu_epilogue(y, p[1:2, :], p[2:3, :], inv_h, pad_cols)
        o_ref[...] = out.astype(o_ref.dtype)


def projection_layer(x, weight, bias, gamma, beta, *, matmul_dtype=None):
    """x: (..., input_dim) -> (..., hidden_dim).

    Matches nn.Sequential(Linear, LayerNorm, ReLU, Dropout) in eval mode.
    `matmul_dtype=jnp.bfloat16` casts the matmul operands in-kernel (f32
    accumulation) to use the bf16-native MXU when accuracy allows.
    """
    orig_shape = x.shape
    d_in = orig_shape[-1]
    hidden = weight.shape[1]
    rows = math.prod(orig_shape[:-1]) if len(orig_shape) > 1 else 1

    in_bytes = x.dtype.itemsize
    w_bytes = weight.dtype.itemsize
    out_bytes = in_bytes

    budget, vmem_limit = _vmem_budget_and_limit()

    # --- padded / tiled dimensions ------------------------------------------
    H_pad = _round_up(hidden, 128)              # lane-dense output slab
    K_full = _round_up(d_in, 128)               # full padded K (resident path)

    row_mult = 8 if in_bytes == 4 else 16
    TM_target = 512 if in_bytes == 4 else 1024
    TM = min(TM_target, _round_up(rows, row_mult))
    # Keep >= 2 row tiles whenever rows allow, so the "parallel" row axis can
    # be sharded across v7x's two TensorCores.
    if rows >= 2 * row_mult:
        TM = min(TM, _round_up((rows + 1) // 2, row_mult))

    params_bytes = 2 * 3 * H_pad * 4            # packed bias/gamma/beta (f32)

    # --- fast path: whole weight resident in VMEM, no K grid axis ------------
    def fast_est(tm):
        return (2 * tm * K_full * in_bytes       # x tiles (double-buffered)
                + 2 * K_full * H_pad * w_bytes   # resident weight (buffer pair)
                + 2 * tm * H_pad * out_bytes     # out tiles (double-buffered)
                + params_bytes)

    fast_tm = TM
    fast_floor = max(row_mult, min(TM, 64))
    while fast_est(fast_tm) > budget and fast_tm > fast_floor:
        fast_tm = max(fast_floor, _round_up(fast_tm // 2, row_mult))
    use_fast = fast_est(fast_tm) <= budget

    if use_fast:
        TM = fast_tm
        TK = K_pad = K_full
    else:
        # --- K-grid fallback: stream 128-aligned weight slices ---------------
        TK = 128
        while TK < 512 and TK < K_full:
            TK *= 2

        def kgrid_est(tm, tk):
            return (2 * tm * tk * in_bytes
                    + 2 * tk * H_pad * w_bytes
                    + 2 * tm * H_pad * out_bytes
                    + tm * H_pad * 4             # f32 accumulator scratch
                    + params_bytes)

        # Back off TK before TM (shrinking TM multiplies weight re-streaming
        # and shrinks the MXU M dim); keep TM a multiple of the sublane pack.
        while kgrid_est(TM, TK) > budget and TK > 128:
            TK //= 2
        while kgrid_est(TM, TK) > budget and TM > row_mult:
            TM = max(row_mult, _round_up(TM // 2, row_mult))
        # TODO(synk): for very large hidden (>= ~8K, v7x 64 MiB VMEM) also tile
        # the hidden (N) axis and carry per-row sum / sum-of-squares across
        # N tiles before a second normalization pass.
        K_pad = _round_up(d_in, TK)

    R_pad = _round_up(rows, TM)

    # --- pad operands only when needed (zero padding keeps LN exact) ---------
    x2 = x.reshape(rows, d_in)
    if R_pad != rows or K_pad != d_in:
        x2 = jnp.pad(x2, ((0, R_pad - rows), (0, K_pad - d_in)))
    w2 = weight
    if K_pad != d_in or H_pad != hidden:
        w2 = jnp.pad(weight, ((0, K_pad - d_in), (0, H_pad - hidden)))

    def _pad_param(p):
        p = p.astype(jnp.float32)
        if H_pad != hidden:
            p = jnp.pad(p, (0, H_pad - hidden))
        return p

    params = jnp.stack([_pad_param(bias), _pad_param(gamma), _pad_param(beta)])

    inv_h = 1.0 / float(hidden)
    pad_cols = H_pad - hidden

    if use_fast:
        kernel = functools.partial(
            _resident_kernel, inv_h=inv_h, pad_cols=pad_cols, mm_dtype=matmul_dtype)
        grid = (R_pad // TM,)
        in_specs = [
            pl.BlockSpec((TM, K_pad), lambda i: (i, 0)),       # x row tile
            pl.BlockSpec((K_pad, H_pad), lambda i: (0, 0)),    # resident weight
            pl.BlockSpec((3, H_pad), lambda i: (0, 0)),        # bias/gamma/beta
        ]
        out_specs = pl.BlockSpec((TM, H_pad), lambda i: (i, 0))
        scratch_shapes = []
        dims = ("parallel",)
    else:
        kernel = functools.partial(
            _kgrid_kernel, inv_h=inv_h, pad_cols=pad_cols, mm_dtype=matmul_dtype)
        grid = (R_pad // TM, K_pad // TK)
        in_specs = [
            pl.BlockSpec((TM, TK), lambda i, k: (i, k)),       # x tile
            pl.BlockSpec((TK, H_pad), lambda i, k: (k, 0)),    # weight slice
            pl.BlockSpec((3, H_pad), lambda i, k: (0, 0)),     # bias/gamma/beta
        ]
        out_specs = pl.BlockSpec((TM, H_pad), lambda i, k: (i, 0))
        scratch_shapes = [pltpu.VMEM((TM, H_pad), jnp.float32)]
        dims = ("parallel", "arbitrary")

    out = pl.pallas_call(
        kernel,
        out_shape=jax.ShapeDtypeStruct((R_pad, H_pad), x.dtype),
        grid=grid,
        in_specs=in_specs,
        out_specs=out_specs,
        scratch_shapes=scratch_shapes,
        compiler_params=pltpu.CompilerParams(
            dimension_semantics=dims,
            vmem_limit_bytes=vmem_limit,
        ),
    )(x2, w2, params)

    if R_pad != rows or H_pad != hidden:
        out = out[:rows, :hidden]
    return out.reshape(*orig_shape[:-1], hidden)


def _reference(x, weight, bias, gamma, beta):
    y = x @ weight + bias
    mean = jnp.mean(y, axis=-1, keepdims=True)
    var = jnp.mean((y - mean) ** 2, axis=-1, keepdims=True)
    yn = (y - mean) / jnp.sqrt(var + LN_EPS)
    return jnp.maximum(yn * gamma + beta, 0.0)


if __name__ == "__main__":
    batch, seq, input_dim, hidden_dim = 2, 8, 16, 32

    key = jax.random.PRNGKey(0)
    kx, kw, kb, kg, kbe = jax.random.split(key, 5)

    x = jax.random.normal(kx, (batch, seq, input_dim), dtype=jnp.float32)
    # Deterministic synthetic parameters (Linear weight stored as (in, out)).
    weight = jax.random.normal(kw, (input_dim, hidden_dim), dtype=jnp.float32) * 0.1
    bias = jax.random.normal(kb, (hidden_dim,), dtype=jnp.float32) * 0.05
    gamma = jnp.ones((hidden_dim,), dtype=jnp.float32) + 0.01 * jax.random.normal(
        kg, (hidden_dim,), dtype=jnp.float32
    )
    beta = 0.01 * jax.random.normal(kbe, (hidden_dim,), dtype=jnp.float32)

    out = projection_layer(x, weight, bias, gamma, beta)
    out = jax.block_until_ready(out)

    ref = _reference(x, weight, bias, gamma, beta)
    assert out.shape == (batch, seq, hidden_dim)
    assert jnp.allclose(out, ref, atol=1e-4, rtol=1e-4)

    print("KERNEL_OK")
</pallas_src>

<mosaic_0001>
module attributes {stable_mosaic.version = 11 : i64} {
  func.func @_resident_kernel(%arg0: i32, %arg1: memref<8x128xf32, #tpu.memory_space<vmem>>, %arg2: memref<128x128xf32, #tpu.memory_space<vmem>>, %arg3: memref<3x128xf32, #tpu.memory_space<vmem>>, %arg4: memref<8x128xf32, #tpu.memory_space<vmem>>) attributes {dimension_semantics = [#tpu.dimension_semantics<parallel>], iteration_bounds = array<i64: 2>, scalar_prefetch = 0 : i64, scratch_operands = 0 : i64, tpu.core_type = #tpu.core_type<tc>, window_params = [{transform_indices = @transform_0, window_bounds = array<i64: 8, 128>}, {pipeline_mode = #tpu.pipeline_mode<synchronous>, transform_indices = @transform_1, window_bounds = array<i64: 128, 128>}, {pipeline_mode = #tpu.pipeline_mode<synchronous>, transform_indices = @transform_2, window_bounds = array<i64: 3, 128>}, {transform_indices = @transform_3, window_bounds = array<i64: 8, 128>}]} {
    %c0 = arith.constant 0 : index
    %c0_0 = arith.constant 0 : index
    %0 = vector.load %arg1[%c0, %c0_0] : memref<8x128xf32, #tpu.memory_space<vmem>>, vector<8x128xf32>
    %c0_1 = arith.constant 0 : index
    %c0_2 = arith.constant 0 : index
    %1 = vector.load %arg2[%c0_1, %c0_2] : memref<128x128xf32, #tpu.memory_space<vmem>>, vector<128x128xf32>
    %c0_3 = arith.constant 0 : index
    %c0_4 = arith.constant 0 : index
    %2 = vector.load %arg3[%c0_3, %c0_4] : memref<3x128xf32, #tpu.memory_space<vmem>>, vector<3x128xf32>
    %cst = arith.constant dense<0.000000e+00> : vector<8x128xf32>
    %3 = tpu.matmul %0, %1, %cst {dimension_numbers = #tpu.dot_dimension_numbers<[1], [0], [0], [1], [0, 0, 1, 1], [], []>} : vector<8x128xf32>, vector<128x128xf32>, vector<8x128xf32> -> vector<8x128xf32>
    %4 = vector.extract_strided_slice %2 {offsets = [0, 0], sizes = [1, 128], strides = [1, 1]} : vector<3x128xf32> to vector<1x128xf32>
    %5 = vector.broadcast %4 : vector<1x128xf32> to vector<8x128xf32>
    %6 = arith.addf %3, %5 : vector<8x128xf32>
    %7 = vector.extract_strided_slice %2 {offsets = [1, 0], sizes = [1, 128], strides = [1, 1]} : vector<3x128xf32> to vector<1x128xf32>
    %8 = vector.extract_strided_slice %2 {offsets = [2, 0], sizes = [1, 128], strides = [1, 1]} : vector<3x128xf32> to vector<1x128xf32>
    %cst_5 = arith.constant dense<0.000000e+00> : vector<8xf32>
    %9 = vector.multi_reduction <add>, %6, %cst_5 [1] : vector<8x128xf32> to vector<8xf32>
    %10 = vector.shape_cast %9 : vector<8xf32> to vector<8x1xf32>
    %cst_6 = arith.constant 3.125000e-02 : f32
    %11 = vector.broadcast %cst_6 : f32 to vector<8x1xf32>
    %12 = arith.mulf %10, %11 : vector<8x1xf32>
    %13 = vector.broadcast %12 : vector<8x1xf32> to vector<8x128xf32>
    %14 = arith.subf %6, %13 : vector<8x128xf32>
    %15 = arith.mulf %14, %14 : vector<8x128xf32>
    %cst_7 = arith.constant dense<0.000000e+00> : vector<8xf32>
    %16 = vector.multi_reduction <add>, %15, %cst_7 [1] : vector<8x128xf32> to vector<8xf32>
    %17 = vector.shape_cast %16 : vector<8xf32> to vector<8x1xf32>
    %18 = arith.mulf %12, %12 : vector<8x1xf32>
    %cst_8 = arith.constant 9.600000e+01 : f32
    %19 = vector.broadcast %cst_8 : f32 to vector<8x1xf32>
    %20 = arith.mulf %19, %18 : vector<8x1xf32>
    %21 = arith.subf %17, %20 : vector<8x1xf32>
    %cst_9 = arith.constant 3.125000e-02 : f32
    %22 = vector.broadcast %cst_9 : f32 to vector<8x1xf32>
    %23 = arith.mulf %21, %22 : vector<8x1xf32>
    %cst_10 = arith.constant 0.000000e+00 : f32
    %24 = vector.broadcast %cst_10 : f32 to vector<8x1xf32>
    %25 = arith.maximumf %23, %24 : vector<8x1xf32>
    %cst_11 = arith.constant 9.99999974E-6 : f32
    %26 = vector.broadcast %cst_11 : f32 to vector<8x1xf32>
    %27 = arith.addf %25, %26 : vector<8x1xf32>
    %28 = math.rsqrt %27 : vector<8x1xf32>
    %29 = vector.broadcast %28 : vector<8x1xf32> to vector<8x128xf32>
    %30 = arith.mulf %14, %29 : vector<8x128xf32>
    %31 = vector.broadcast %7 : vector<1x128xf32> to vector<8x128xf32>
    %32 = arith.mulf %30, %31 : vector<8x128xf32>
    %33 = vector.broadcast %8 : vector<1x128xf32> to vector<8x128xf32>
    %34 = arith.addf %32, %33 : vector<8x128xf32>
    %cst_12 = arith.constant 0.000000e+00 : f32
    %35 = vector.broadcast %cst_12 : f32 to vector<8x128xf32>
    %36 = arith.maximumf %34, %35 : vector<8x128xf32>
    %c0_13 = arith.constant 0 : index
    %c0_14 = arith.constant 0 : index
    %37 = vector.load %arg4[%c0_13, %c0_14] : memref<8x128xf32, #tpu.memory_space<vmem>>, vector<8x128xf32>
    tpu.vector_store %arg4[%c0_13, %c0_14], %36 {strides = array<i32>} : memref<8x128xf32, #tpu.memory_space<vmem>>, vector<8x128xf32>,
    return
  }
  func.func @transform_0(%arg0: i32) -> (i32, i32) {
    %c0_i32 = arith.constant 0 : i32
    %c0_i32_0 = arith.constant 0 : i32
    return %arg0, %c0_i32 : i32, i32
  }
  func.func @transform_1(%arg0: i32) -> (i32, i32) {
    %c0_i32 = arith.constant 0 : i32
    %c0_i32_0 = arith.constant 0 : i32
    %c0_i32_1 = arith.constant 0 : i32
    return %c0_i32, %c0_i32_0 : i32, i32
  }
  func.func @transform_2(%arg0: i32) -> (i32, i32) {
    %c0_i32 = arith.constant 0 : i32
    %c0_i32_0 = arith.constant 0 : i32
    %c0_i32_1 = arith.constant 0 : i32
    return %c0_i32, %c0_i32_0 : i32, i32
  }
  func.func @transform_3(%arg0: i32) -> (i32, i32) {
    %c0_i32 = arith.constant 0 : i32
    %c0_i32_0 = arith.constant 0 : i32
    return %arg0, %c0_i32 : i32, i32
  }
}

</mosaic_0001>

<bundles_post_ra>
// kernel: tpu_custom_call.1
= control target key start
LH: loop header
LB: loop body
LE: loop exit
PB: predicated region body
PF: predicated region fallthrough
CT: control target
= control target key end

     0   :  { %8 = vsyncpa [#allocation3], 0  ;;  %s818_s0 = inlined_call_operand.hbm [shape: f32[16,128], index: 0, kind: input, shape index: {}]   ;;  %s819_s1 = inlined_call_operand.hbm [shape: f32[128,128], index: 1, kind: input, shape index: {}]   ;;  %s820_s2 = inlined_call_operand.hbm [shape: f32[3,128], index: 2, kind: input, shape index: {}]   ;;  %s821_s3 = inlined_call_operand.hbm [shape: f32[16,128], index: 3, kind: output, shape index: {}]  }
   0x1   :  { %10 = vsyncpa [#allocation3 + $0x1], 0 }
   0x2   :  { %11 = vsyncpa [#allocation6], 0 }
   0x3   :  { %12 = vsyncpa [#allocation4], 0 }
   0x4   :  { %14 = vsyncpa [#allocation4 + $0x1], 0  ;;  %s666_s12 = smov 0   ;;  %s668_s13 = smov 0  }
   0x5   :  { %s670_s14 = smov 0   ;;  %s672_s15 = smov 0  }
   0x6 LB: > { %s130_s18 = sshll.u32 %s819_s1, 4  ;;  %s690_s19 = sadd.s32 4294967295, %s640_s15   ;;  %s640_s15 = sphi %s672_s15, %s832_s15   ;;  %s636_s14 = sphi %s670_s14, %s831_s14   ;;  %s632_s13 = sphi %s668_s13, %s830_s13   ;;  %s628_s12 = sphi %s666_s12, %s829_s12   ;;  %s131_s18 = int_to_ptr.hbm [resolvable:$true] %s130_s18 }
   0x7   : > { %p394_p0 = scmp.ge.s32.totalorder %s640_s15, 1  ;;  %p41_p1 = scmp.eq.s32.totalorder %s690_s19, 0 }
   0x8   : > { %p119_p2 = scmp.lt.s32.totalorder %s640_s15, 3  ;;  %s642_s21 = smov [#allocation5]  }
   0x9   : > { %s132_s22 = sshll.u32 %s642_s21, 4  ;;  %s145_s25 = sshll.u32 %s820_s2, 4  ;;  %s133_s22 = int_to_ptr.vmem [resolvable:$true] %s132_s22  ;;  %s146_s25 = int_to_ptr.hbm [resolvable:$true] %s145_s25 }
   0xa   : > { %p695_p3 = pnand %p394_p0, %p119_p2  ;;  %s643_s26 = smov [#allocation7]  }
   0xb   : > { %s147_s27 = sshll.u32 %s643_s26, 4  ;;  %s644_s28 = smov 128   ;;  %s148_s27 = int_to_ptr.vmem [resolvable:$true] %s147_s27 }
   0xc   : > { %p421_p4 = pneg %p695_p3  ;;  %s645_s29 = smov 8  }
   0xd   : > { %s393_s30 = sadd.s32 4294967294, %s640_s15   ;;  %s709_s4 = sadd.s32 1, %s640_s15  }
   0xe   : > { %p422_p6 = pnand %p421_p4, %p41_p1  ;;  %s24_s5 = ssub.s32 %s640_s15, %s709_s4 }
   0xf   : > { %s27_s6 = sadd.s32 1, %s636_s14  ;;  %p25_p7 = scmp.eq.s32.totalorder %s24_s5, 0 }
  0x10   : > { %424 = dma.hbm_to_vmem [thread:$0]  (!%p422_p6), %s131_s18, 2048, %s133_s22, [#allocation6], %s644_s28, %s644_s28, %s645_s29  }
  0x11   : > { %427 = dma.hbm_to_vmem [thread:$0]  (!%p422_p6), %s146_s25, 64, %s148_s27, [#allocation6]  }
  0x12   : > { %p34_p8 = scmp.ne.s32.totalorder %s636_s14, %s632_s13  ;;  %p35_p9 = scmp.eq.s32.totalorder %s640_s15, 0 }
  0x13   : > { %p40_p10 = scmp.ne.s32.totalorder %s632_s13, %s628_s12  ;;  %p106_p13 = scmp.eq.s32.totalorder %s690_s19, 1 }
  0x14   : > { %s720_s7 = scalar_select %p25_p7, %s636_s14, %s27_s6  }
  0x15   : > { %p722_p11 = por %p35_p9, %p34_p8  ;;  %p728_p12 = por %p41_p1, %p40_p10 }
  0x16   : > { %p112_p0 = scmp.eq.s32.totalorder %s393_s30, 1  ;;  %p438_p2 = scmp.lt.s32.totalorder %s640_s15, 2 }
  0x17   : > { %s158_s10 = sand.u32 1, %s636_s14   ;;  %p735_p4 = por %p106_p13, %p34_p8 }
  0x18   : > { %p739_p6 = por %p112_p0, %p40_p10  ;;  %s398_s17 = sshll.u32 %s158_s10, 3 }
  0x19   : > { %s399_s18 = sshll.u32 %s640_s15, 3  ;;  %s162_s24 = scalar_lea.vmem [#allocation2], %s398_s17 }
  0x1a   : > { %s166_s23 = scalar_lea.hbm %s818_s0, %s399_s18  ;;  %s170_s25 = sshll.u32 %s162_s24, 4  ;;  %s171_s25 = int_to_ptr.vmem [resolvable:$true] %s170_s25 }
  0x1b   : > { %s168_s26 = sshll.u32 %s166_s23, 4  ;;  %p749_p7 = pnand %p438_p2, %p722_p11  ;;  %s169_s26 = int_to_ptr.hbm [resolvable:$true] %s168_s26 }
  0x1c   : > { %s159_s28 = scalar_lea.sflag [#allocation3], %s158_s10  ;;  %s540_s29 = sshra.s32 %s169_s26, 4  ;;  %s541_s29 = int_to_ptr.hbm [resolvable:$true] %s540_s29 }
  0x1d   : > { %s542_s30 = scalar_lea.hbm %s541_s29, 8  ;;  %p544_p9 = pneg %p749_p7 }
  0x1e   : > { %p543_p8 = scmp.ne.s32.totalorder %s541_s29, %s542_s30  ;;  %s547_s17 = scalar_lea.hbm %s818_s0, 16 }
  0x1f   : > { %p548_p11 = scmp.lt.s32.totalorder %s541_s29, %s818_s0  ;;  %p549_p0 = scmp.lt.s32.totalorder %s547_s17, %s542_s30 }
  0x20   : > { %p545_p10 = pnand %p544_p9, %p543_p8 }
  0x21   : > { %p550_p2 = por %p549_p0, %p548_p11 }
  0x22   : > { %p546_p13 = pneg %p545_p10 }
  0x24   : > { %p551_p5 = pnand %p550_p2, %p546_p13 }
  0x26   : > { %554 = shalt.err (!%p551_p5)
}
  0x27   : > { %431 = dma.hbm_to_vmem [thread:$0]  (!%p749_p7), %s169_s26, 128, %s171_s25, %s159_s28  }
  0x28   : > { %179 = sbr.rel (%p695_p3) target bundleno = 483 (0x1e3), region = 32  ;;  %s766_s10 = sand.u32 (!%p695_p3), 1, %s632_s13  }
  0x29   : > { %s401_s21 = sshll.u32 (!%p695_p3), %s766_s10, 3  ;;  %s182_s22 = scalar_lea.sflag (!%p695_p3), [#allocation3], %s766_s10 }
  0x2a   : > { %s772_s23 = scalar_lea.vmem (!%p695_p3), [#allocation2], %s401_s21 }
  0x2d   : > { %615 = dma.done.wait (%p728_p12), %s182_s22, 128  }
  0x2e   : > { %617 = vsyncadd (%p728_p12), %s182_s22, 4294967168 }
  0x2f   : > { %619 = dma.done.wait (%p41_p1), [#allocation6], 2112  }
  0x30   : > { %621 = vsyncadd (%p41_p1), [#allocation6], 4294965184  ;;  %v235_v0 = vld [vmem:[#allocation5 + $0x78] sm:$0xff]  ;;  %v234_v1 = vld [vmem:[#allocation5 + $0x70] sm:$0xff]  ;;  %s406_s20 = sshll.u32 %s690_s19, 3  ;;  %s218_s26 = scalar_lea.vmem [#allocation8], %s401_s21 }
  0x31   : > { %238 = vmatpush.msra.mxu0 %v235_v0  ;;  %v233_v2 = vld [vmem:[#allocation5 + $0x68] sm:$0xff]  ;;  %v232_v3 = vld [vmem:[#allocation5 + $0x60] sm:$0xff]  ;;  %v231_v4 = vld [vmem:[#allocation5 + $0x58] sm:$0xff]  ;;  %s299_s25 = scalar_lea.hbm %s821_s3, %s406_s20  ;;  %s301_s27 = sshll.u32 %s218_s26, 4  ;;  %s302_s27 = int_to_ptr.vmem [resolvable:$true] %s301_s27 }
  0x32   : > { %v230_v5 = vld [vmem:[#allocation5 + $0x50] sm:$0xff]  ;;  %v229_v6 = vld [vmem:[#allocation5 + $0x48] sm:$0xff]  ;;  %v228_v7 = vld [vmem:[#allocation5 + $0x40] sm:$0xff]  ;;  %s303_s28 = sshll.u32 %s299_s25, 4  ;;  %s289_s19 = scalar_lea.sflag [#allocation4], %s766_s10  ;;  %s304_s28 = int_to_ptr.hbm [resolvable:$true] %s303_s28 }
  0x33   : > { %239 = vmatpush.msra.mxu0 %v234_v1  ;;  %v227_v8 = vld [vmem:[#allocation5 + $0x38] sm:$0xff]  ;;  %v226_v9 = vld [vmem:[#allocation5 + $0x30] sm:$0xff]  ;;  %v225_v10 = vld [vmem:[#allocation5 + $0x28] sm:$0xff]  ;;  %s584_s29 = sshra.s32 %s304_s28, 4  ;;  %s590_s17 = scalar_lea.hbm %s821_s3, 16  ;;  %s585_s29 = int_to_ptr.hbm [resolvable:$true] %s584_s29 }
  0x34   : > { %v224_v11 = vld [vmem:[#allocation5 + $0x20] sm:$0xff]  ;;  %v223_v12 = vld [vmem:[#allocation5 + $0x18] sm:$0xff]  ;;  %v222_v13 = vld [vmem:[#allocation5 + $0x10] sm:$0xff]  ;;  %s586_s30 = scalar_lea.hbm %s585_s29, 8  ;;  %p591_p12 = scmp.lt.s32.totalorder %s585_s29, %s821_s3 }
  0x35   : > { %240 = vmatpush.msra.mxu0 %v233_v2  ;;  %v221_v14 = vld [vmem:[#allocation5 + $0x8] sm:$0xff]  ;;  %v220_v15 = vld [vmem:[#allocation5] sm:$0xff]  ;;  %v219_v16 = vld [vmem:[%s772_s23] sm:$0xff]  ;;  %p587_p1 = scmp.ne.s32.totalorder %s585_s29, %s586_s30  ;;  %p592_p7 = scmp.lt.s32.totalorder %s590_s17, %s586_s30 }
  0x36   : > { %v236_v17 = vld [vmem:[#allocation7] sm:$0x7] }
  0x37   : > { %241 = vmatpush.msra.mxu0 %v232_v3  ;;  %v237_v18 = vperm.slane %v236_v17, 0  ;;  %v282_v38 = vperm.slane %v236_v17, 1  ;;  %v284_v40 = vperm.slane %v236_v17, 2  ;;  %p588_p3 = pnand %p587_p1, %p735_p4  ;;  %p593_p8 = por %p592_p7, %p591_p12 }
  0x39   : > { %242 = vmatpush.msra.mxu0 %v231_v4  ;;  %p589_p5 = pneg %p588_p3 }
  0x3b   : > { %243 = vmatpush.msra.mxu0 %v230_v5  ;;  %p594_p9 = pnand %p593_p8, %p589_p5 }
  0x3d   : > { %244 = vmatpush.msra.mxu0 %v229_v6 }
  0x3f   : > { %245 = vmatpush.msra.mxu0 %v228_v7 }
  0x41   : > { %246 = vmatpush.msra.mxu0 %v227_v8 }
  0x43   : > { %247 = vmatpush.msra.mxu0 %v226_v9 }
  0x45   : > { %248 = vmatpush.msra.mxu0 %v225_v10 }
  0x47   : > { %249 = vmatpush.msra.mxu0 %v224_v11 }
  0x49   : > { %250 = vmatpush.msra.mxu0 %v223_v12 }
  0x4b   : > { %251 = vmatpush.msra.mxu0 %v222_v13 }
  0x4d   : > { %252 = vmatpush.msra.mxu0 %v221_v14 }
  0x4f   : > { %253 = vmatpush.msra.mxu0 %v220_v15 }
  0x50   : > { %254 = vmatmul.f32.vlgmr.msra.gmra.mxu0 %v219_v16 }
  0xcd   : > { %v255_v19 = vpop.f32.mrf.mxu0 }
  0xce   : > { %v256_v20 = vadd.f32 %v255_v19, %v237_v18 }
  0xd0   : > { %258 = vadd.xlane.f32.xlu0 %v256_v20 }
 0x143   : > { %v259_v21 = vpop.xlane.xlu0 %258 }
 0x144   : > { %v260_v22 = vmul.f32 0.03125, %v259_v21 }
 0x146   : > { %v261_v23 = vsub.f32 %v256_v20, %v260_v22  ;;  %v265_v25 = vmul.f32 %v260_v22, %v260_v22 }
 0x148   : > { %v262_v24 = vmul.f32 %v261_v23, %v261_v23  ;;  %v266_v26 = vmul.f32 96.0, %v265_v25 }
 0x14a   : > { %263 = vadd.xlane.f32.xlu0 %v262_v24 }
 0x1bd   : > { %v264_v27 = vpop.xlane.xlu0 %263 }
 0x1be   : > { %v267_v28 = vsub.f32 %v264_v27, %v266_v26 }
 0x1c0   : > { %v268_v29 = vmul.f32 0.03125, %v267_v28 }
 0x1c2   : > { %v269_v30 = vmax.f32 %v268_v29, 0.0 }
 0x1c4   : > { %v270_v31 = vadd.f32 1e-05, %v269_v30 }
 0x1c6   : > { %478 = vrsqrt.f32 %v270_v31  ;;  %vm277_vm1 = vweird.f32 %v270_v31 }
 0x1cc   : > { %v479_v32 = vpop.eup %478 }
 0x1cd   : > { %v272_v33 = vmul.f32 %v479_v32, %v270_v31  ;;  %vm278_vm0 = vweird.f32 %v479_v32 }
 0x1ce   : > { %vm279_vm2 = vmor %vm277_vm1, %vm278_vm0 }
 0x1cf   : > { %v273_v34 = vmul.f32 %v479_v32, %v272_v33 }
 0x1d1   : > { %v274_v35 = vmul.f32 0.5, %v273_v34 }
 0x1d3   : > { %v275_v36 = vsub.f32 1.5, %v274_v35 }
 0x1d5   : > { %v276_v37 = vmul.f32 %v479_v32, %v275_v36 }
 0x1d7   : > { %v280_v39 = vsel %vm279_vm2, %v479_v32, %v276_v37 }
 0x1d8   : > { %v281_v41 = vmul.f32 %v280_v39, %v261_v23 }
 0x1da   : > { %v283_v42 = vmul.f32 %v282_v38, %v281_v41 }
 0x1dc   : > { %v285_v43 = vadd.f32 %v284_v40, %v283_v42 }
 0x1de   : > { %v286_v44 = vmax.f32 %v285_v43, 0.0 }
 0x1e0   : > { %287 = vst [vmem:[%s218_s26] sm:$0xff] %v286_v44 }
 0x1e1   : > { %597 = shalt.err (!%p594_p9)
}
 0x1e2   : > { %419 = dma.vmem_to_hbm [thread:$0]  (%p735_p4), %s302_s27, 128, %s304_s28, %s289_s19  }
 0x1e3 PF: > { %s315_s10 = sand.u32 1, %s628_s12   ;;  %p828_p10 = scmp.ge.s32.totalorder %s640_s15, 2 }
 0x1e4   : > { %s316_s21 = scalar_lea.sflag [#allocation4], %s315_s10 }
 0x1e5   : > { %p433_p13 = pnand %p828_p10, %p739_p6 }
 0x1e7   : > { %p434_p11 = pneg %p433_p13 }
 0x1e9   : > { %623 = dma.done.wait (%p434_p11), %s316_s21, 128  }
 0x1ea   : > { %625 = vsyncadd (%p434_p11), %s316_s21, 4294967168  ;;  %p17_p0 = scmp.ge.s32.totalorder %s709_s4, 4   ;;  %s829_s12 = smov %s632_s13 }
 0x1eb   : > { %s830_s13 = smov %s636_s14  ;;  %s831_s14 = smov %s720_s7 }
 0x1ec   : > { %s832_s15 = smov %s709_s4  ;;  %19 = sbr.rel (!%p17_p0) target bundleno = 6 (0x6), region = 85 }
 0x1f1   :  { %322 = vsyncpa [#allocation3], 1 }
 0x1f2   :  { %324 = vsyncpa [#allocation3 + $0x1], 1 }
 0x1f3   :  { %325 = vsyncpa [#allocation6], 1 }
 0x1f4   :  { %326 = vsyncpa [#allocation4], 1 }
 0x1f5   :  { %328 = vsyncpa [#allocation4 + $0x1], 1 }

</bundles_post_ra>
